<compile_context>
chip_gen: v5e
topology: v5e:2x2
jax: 0.10.0
libtpu: 0.0.40
codegen_flags: <defaults>
</compile_context>

<pallas_src>
import functools

import jax
import jax.numpy as jnp
from jax.experimental import pallas as pl
from jax.experimental.pallas import tpu as pltpu

_LANES = 128
_BLOCK_ROWS = 4096                         # 4096 x 128 x 4B = 2 MiB per f32 block
_SOFTPLUS_THRESHOLD = 20.0                 # matches torch.nn.functional.softplus


def _smooth_leaky_relu_kernel(x_ref, o_ref, *, gamma, inv_beta, beta, one_minus_gamma):
    x = x_ref[...]
    bx = beta * x
    # Numerically-stable softplus, identical to PyTorch's threshold behavior:
    #   softplus = x                              where beta*x > 20
    #            = log1p(exp(beta*x)) * (1/beta)  otherwise
    safe_bx = jnp.minimum(bx, _SOFTPLUS_THRESHOLD)   # avoid overflow on untaken branch
    sp = jnp.where(bx > _SOFTPLUS_THRESHOLD, x, jnp.log1p(jnp.exp(safe_bx)) * inv_beta)
    o_ref[...] = sp * one_minus_gamma + gamma * x


def _smooth_leaky_relu_jnp(x, gamma, beta):
    """Plain-JAX fallback (only ever sees the <128-element ragged tail)."""
    bx = beta * x
    sp = jnp.where(bx > _SOFTPLUS_THRESHOLD, x,
                   jnp.log1p(jnp.exp(jnp.minimum(bx, _SOFTPLUS_THRESHOLD))) * (1.0 / beta))
    return sp * (1.0 - gamma) + gamma * x


def _run_slab(slab, gamma, beta):
    """Run the elementwise kernel on a (rows, 128) slab."""
    rows = slab.shape[0]
    # Full extent if small (any row count is legal when block == array extent),
    # otherwise 2 MiB blocks; Pallas masks the ragged last block.
    block_rows = min(_BLOCK_ROWS, rows)
    grid = (pl.cdiv(rows, block_rows),)

    kernel = functools.partial(
        _smooth_leaky_relu_kernel,
        gamma=float(gamma),
        beta=float(beta),
        inv_beta=1.0 / float(beta),
        one_minus_gamma=1.0 - float(gamma),
    )

    itemsize = slab.dtype.itemsize
    n_elems = rows * _LANES
    cost = pl.CostEstimate(
        flops=5 * n_elems,
        transcendentals=2 * n_elems,           # exp + log1p
        bytes_accessed=2 * n_elems * itemsize,
    )

    return pl.pallas_call(
        kernel,
        out_shape=jax.ShapeDtypeStruct((rows, _LANES), slab.dtype),
        grid_spec=pltpu.PrefetchScalarGridSpec(
            num_scalar_prefetch=0,
            grid=grid,
            in_specs=[pl.BlockSpec((block_rows, _LANES), lambda i: (i, 0))],
            out_specs=pl.BlockSpec((block_rows, _LANES), lambda i: (i, 0)),
        ),
        compiler_params=pltpu.CompilerParams(
            dimension_semantics=("parallel",),      # shards across TCs on v7x megacore
            vmem_limit_bytes=32 * 1024 * 1024,      # safe on v5e/v6e/v7x; >> 8 MiB used
        ),
        cost_estimate=cost,
    )(slab)


@functools.partial(jax.jit, static_argnames=("gamma", "beta"))
def smooth_leaky_relu(x, gamma: float, beta: float):
    """Elementwise SmoothLeakyReLU via a Pallas TPU kernel. Works for any shape."""
    orig_shape = x.shape
    flat = x.reshape(-1)
    n = flat.shape[0]

    if n == 0:
        return x

    # Only lane divisibility (128) is required for the zero-copy slab view.
    n_main = (n // _LANES) * _LANES

    if n_main == n:
        slab = flat.reshape(n // _LANES, _LANES)
        return _run_slab(slab, gamma, beta).reshape(orig_shape)

    if n_main == 0:
        # Tiny input (< 128 elements): kernel launch not worth it.
        return _smooth_leaky_relu_jnp(flat, gamma, beta).reshape(orig_shape)

    # Ragged case: kernel on the 128-divisible prefix, plain jnp on the
    # <128-element tail (fuses with the concat under jit).
    main = flat[:n_main].reshape(n_main // _LANES, _LANES)
    out_main = _run_slab(main, gamma, beta).reshape(-1)
    out_tail = _smooth_leaky_relu_jnp(flat[n_main:], gamma, beta)
    return jnp.concatenate([out_main, out_tail]).reshape(orig_shape)


def _reference(x, gamma, beta):
    # Pure-JAX reference mirroring torch.nn.functional.softplus semantics.
    bx = beta * x
    sp = jnp.where(bx > _SOFTPLUS_THRESHOLD, x,
                   jnp.log1p(jnp.exp(jnp.minimum(bx, _SOFTPLUS_THRESHOLD))) / beta)
    return sp * (1 - gamma) + gamma * x


if __name__ == "__main__":
    # Deterministic "parameters" for the module (gamma, beta from __init__).
    gamma = 0.1
    beta = 1.5

    key = jax.random.PRNGKey(0)

    # Primary test: NCHW input, small shape (element count divisible by 128).
    x = jax.random.normal(key, (2, 4, 16, 16), dtype=jnp.float32) * 5.0
    out = jax.block_until_ready(smooth_leaky_relu(x, gamma, beta))
    ref = _reference(x, gamma, beta)
    assert out.shape == x.shape and out.dtype == x.dtype
    assert jnp.allclose(out, ref, atol=1e-5, rtol=1e-5), "mismatch vs reference (divisible)"

    # Secondary test: ragged element count exercises the prefix+tail path.
    x2 = jax.random.normal(jax.random.PRNGKey(1), (3, 5, 7, 11), dtype=jnp.float32) * 5.0
    out2 = jax.block_until_ready(smooth_leaky_relu(x2, gamma, beta))
    ref2 = _reference(x2, gamma, beta)
    assert out2.shape == x2.shape and out2.dtype == x2.dtype
    assert jnp.allclose(out2, ref2, atol=1e-5, rtol=1e-5), "mismatch vs reference (ragged)"

    # Larger slab exercising the multi-block grid (ragged last block rows).
    x3 = jax.random.normal(jax.random.PRNGKey(2), (2, 8, 64, 130), dtype=jnp.float32) * 5.0
    out3 = jax.block_until_ready(smooth_leaky_relu(x3, gamma, beta))
    ref3 = _reference(x3, gamma, beta)
    assert jnp.allclose(out3, ref3, atol=1e-5, rtol=1e-5), "mismatch vs reference (large)"

    print("KERNEL_OK")
</pallas_src>

<mosaic_0001>
module attributes {stable_mosaic.version = 11 : i64} {
  func.func @_smooth_leaky_relu_kernel(%arg0: i32, %arg1: memref<16x128xf32, #tpu.memory_space<vmem>>, %arg2: memref<16x128xf32, #tpu.memory_space<vmem>>) attributes {dimension_semantics = [#tpu.dimension_semantics<parallel>], iteration_bounds = array<i64: 1>, scalar_prefetch = 0 : i64, scratch_operands = 0 : i64, tpu.core_type = #tpu.core_type<tc>, window_params = [{transform_indices = @transform_0, window_bounds = array<i64: 16, 128>}, {transform_indices = @transform_1, window_bounds = array<i64: 16, 128>}]} {
    %c0 = arith.constant 0 : index
    %c0_0 = arith.constant 0 : index
    %0 = vector.load %arg1[%c0, %c0_0] : memref<16x128xf32, #tpu.memory_space<vmem>>, vector<16x128xf32>
    %cst = arith.constant 1.500000e+00 : f32
    %1 = vector.broadcast %cst : f32 to vector<16x128xf32>
    %2 = arith.mulf %1, %0 : vector<16x128xf32>
    %cst_1 = arith.constant 2.000000e+01 : f32
    %3 = vector.broadcast %cst_1 : f32 to vector<16x128xf32>
    %4 = arith.minimumf %2, %3 : vector<16x128xf32>
    %cst_2 = arith.constant 2.000000e+01 : f32
    %5 = vector.broadcast %cst_2 : f32 to vector<16x128xf32>
    %6 = arith.cmpf ogt, %2, %5 : vector<16x128xf32>
    %7 = math.exp %4 : vector<16x128xf32>
    %8 = math.log1p %7 : vector<16x128xf32>
    %cst_3 = arith.constant 0.666666686 : f32
    %9 = vector.broadcast %cst_3 : f32 to vector<16x128xf32>
    %10 = arith.mulf %8, %9 : vector<16x128xf32>
    %11 = arith.select %6, %0, %10 : vector<16x128xi1>, vector<16x128xf32>
    %cst_4 = arith.constant 0.899999976 : f32
    %12 = vector.broadcast %cst_4 : f32 to vector<16x128xf32>
    %13 = arith.mulf %11, %12 : vector<16x128xf32>
    %cst_5 = arith.constant 1.000000e-01 : f32
    %14 = vector.broadcast %cst_5 : f32 to vector<16x128xf32>
    %15 = arith.mulf %14, %0 : vector<16x128xf32>
    %16 = arith.addf %13, %15 : vector<16x128xf32>
    %c0_6 = arith.constant 0 : index
    %c0_7 = arith.constant 0 : index
    %17 = vector.load %arg2[%c0_6, %c0_7] : memref<16x128xf32, #tpu.memory_space<vmem>>, vector<16x128xf32>
    tpu.vector_store %arg2[%c0_6, %c0_7], %16 {strides = array<i32>} : memref<16x128xf32, #tpu.memory_space<vmem>>, vector<16x128xf32>,
    return
  }
  func.func @transform_0(%arg0: i32) -> (i32, i32) {
    %c0_i32 = arith.constant 0 : i32
    %c0_i32_0 = arith.constant 0 : i32
    return %arg0, %c0_i32 : i32, i32
  }
  func.func @transform_1(%arg0: i32) -> (i32, i32) {
    %c0_i32 = arith.constant 0 : i32
    %c0_i32_0 = arith.constant 0 : i32
    return %arg0, %c0_i32 : i32, i32
  }
}

</mosaic_0001>

<bundles_post_ra>
// kernel: smooth_leaky_relu.1
= control target key start
LH: loop header
LB: loop body
LE: loop exit
PB: predicated region body
PF: predicated region fallthrough
CT: control target
= control target key end

     0   :  { %s84_s0 = inlined_call_operand.vmem [shape: f32[16,128], index: 0, kind: input, shape index: {}]   ;;  %s85_s1 = inlined_call_operand.vmem [shape: f32[16,128], index: 1, kind: output, shape index: {}]  }
   0x1   :  { %v8_v0 = vld [vmem:[%s84_s0] sm:$0xff]  ;;  %v9_v1 = vld [vmem:[%s84_s0 + $0x8] sm:$0xff] }
   0x2   :  { %v10_v2 = vmul.f32 1.5, %v8_v0  ;;  %v11_v3 = vmul.f32 1.5, %v9_v1  ;;  %v44_v27 = vmul.f32 0.1, %v8_v0  ;;  %v45_v30 = vmul.f32 0.1, %v9_v1 }
   0x4   :  { %v12_v4 = vmin.f32 %v10_v2, 20.0  ;;  %v13_v5 = vmin.f32 %v11_v3, 20.0  ;;  %vm14_vm2 = vcmp.gt.f32.partialorder %v10_v2, 20.0  ;;  %vm15_vm3 = vcmp.gt.f32.partialorder %v11_v3, 20.0 }
   0x6   :  { %v16_v6 = vmul.f32 1.442695, %v12_v4  ;;  %v18_v7 = vmul.f32 1.442695, %v13_v5 }
   0x8   :  { %54 = vpow2.f32 %v16_v6 }
   0x9   :  { %56 = vpow2.f32 %v18_v7 }
   0xe   :  { %v55_v8 = vpop.eup %54 }
   0xf   :  { %v57_v9 = vpop.eup %56  ;;  %v20_v10 = vadd.f32 1.0, %v55_v8  ;;  %v23_v11 = vmul.f32 -0.5, %v55_v8  ;;  %v26_v15 = vand.u32 2147483647, %v55_v8 }
  0x10   :  { %v29_v12 = vadd.f32 1.0, %v57_v9  ;;  %v32_v13 = vmul.f32 -0.5, %v57_v9  ;;  %v35_v17 = vand.u32 2147483647, %v57_v9 }
  0x11   :  { %58 = vlog2.f32 %v20_v10  ;;  %v24_v14 = vadd.f32 1.0, %v23_v11  ;;  %vm27_vm0 = vcmp.lt.f32.partialorder %v26_v15, 0.0004427343 }
  0x12   :  { %60 = vlog2.f32 %v29_v12  ;;  %v33_v16 = vadd.f32 1.0, %v32_v13  ;;  %vm36_vm1 = vcmp.lt.f32.partialorder %v35_v17, 0.0004427343 }
  0x13   :  { %v25_v18 = vmul.f32 %v55_v8, %v24_v14 }
  0x14   :  { %v34_v20 = vmul.f32 %v57_v9, %v33_v16 }
  0x17   :  { %v59_v19 = vpop.eup %58 }
  0x18   :  { %v61_v21 = vpop.eup %60  ;;  %v22_v22 = vmul.f32 0.6931472, %v59_v19 }
  0x19   :  { %v31_v23 = vmul.f32 0.6931472, %v61_v21 }
  0x1a   :  { %v28_v24 = vsel %vm27_vm0, %v25_v18, %v22_v22 }
  0x1b   :  { %v38_v25 = vmul.f32 0.6666667, %v28_v24  ;;  %v37_v26 = vsel %vm36_vm1, %v34_v20, %v31_v23 }
  0x1c   :  { %v39_v28 = vmul.f32 0.6666667, %v37_v26 }
  0x1d   :  { %v40_v29 = vsel %vm14_vm2, %v8_v0, %v38_v25 }
  0x1e   :  { %v42_v31 = vmul.f32 0.9, %v40_v29  ;;  %v41_v32 = vsel %vm15_vm3, %v9_v1, %v39_v28 }
  0x1f   :  { %v43_v33 = vmul.f32 0.9, %v41_v32 }
  0x20   :  { %v46_v34 = vadd.f32 %v44_v27, %v42_v31 }
  0x21   :  { %v47_v35 = vadd.f32 %v45_v30, %v43_v33 }
  0x22   :  { %48 = vst [vmem:[%s85_s1] sm:$0xff] %v46_v34 }
  0x23   :  { %49 = vst [vmem:[%s85_s1 + $0x8] sm:$0xff] %v47_v35 }

</bundles_post_ra>
